<compile_context>
chip_gen: v5e
topology: v5e:2x2
jax: 0.10.0
libtpu: 0.0.40
codegen_flags: <defaults>
</compile_context>

<pallas_src>
import jax
import jax.numpy as jnp
from jax.experimental import pallas as pl
from jax.experimental.pallas import tpu as pltpu

LANE = 128
_CHUNK = 1024                    # inner lane chunk: bounds vreg live ranges
_TARGET_BLOCK_BYTES = 4 << 20    # ~4 MiB of activation bytes per grid step


def _make_kernel(tile_b, C, tile_m, chunk):
    chunk = min(chunk, tile_m)
    n_full = tile_m // chunk
    rem = tile_m - n_full * chunk

    def _fma_chunk(x_ref, w_ref, b_ref, o_ref, off, width):
        # One lane-chunk for every batch row in the block: C scalar-broadcast
        # FMAs on the VPU (weights & bias are SMEM scalars), f32 accumulation.
        for bi in range(tile_b):
            xb = x_ref[bi, :, pl.ds(off, width)].astype(jnp.float32)  # [C, width]
            acc = xb[0:1, :] * w_ref[0] + b_ref[0]
            for c in range(1, C):
                acc = acc + xb[c:c + 1, :] * w_ref[c]
            o_ref[bi, :, pl.ds(off, width)] = acc.astype(o_ref.dtype)

    def kernel(x_ref, w_ref, b_ref, o_ref):
        # x_ref: [tile_b, C, tile_m] VMEM activations (spatial on lanes)
        # w_ref: [C] f32 SMEM, b_ref: [1] f32 SMEM
        # o_ref: [tile_b, 1, tile_m] lane-dense output block
        if n_full == 1:
            _fma_chunk(x_ref, w_ref, b_ref, o_ref, 0, chunk)
        else:
            def body(j, carry):
                off = j * chunk
                if chunk % LANE == 0:
                    off = pl.multiple_of(off, LANE)
                _fma_chunk(x_ref, w_ref, b_ref, o_ref, off, chunk)
                return carry
            jax.lax.fori_loop(0, n_full, body, 0)
        if rem:
            _fma_chunk(x_ref, w_ref, b_ref, o_ref, n_full * chunk, rem)

    return kernel


def _choose_tiling(B, C, M, itemsize, target_bytes):
    row_bytes = C * M * itemsize          # one batch row of activations
    if row_bytes >= target_bytes:
        # Large spatial extent: one batch row per step, byte-sized lane tile
        # (multiple of 128 lanes).
        tile_b = 1
        lanes = max(LANE, (target_bytes // (C * itemsize)) // LANE * LANE)
        tile_m = min(lanes, M)
    else:
        # Skinny spatial extent: take the full spatial axis and fold batch rows
        # into one step so per-step DMA bytes stay up.
        tile_m = M
        tile_b = int(min(B, max(1, target_bytes // max(row_bytes, 1)), 8))

    # Give a megacore (v7x: 2 TCs) at least two parallel grid steps on
    # non-trivial inputs.
    if (pl.cdiv(B, tile_b) * pl.cdiv(M, tile_m) < 2
            and B * C * M * itemsize > (2 << 20)):
        if tile_b > 1:
            tile_b = max(1, tile_b // 2)
        elif M >= 2 * LANE:
            tile_m = max(LANE, (((M + 1) // 2 + LANE - 1) // LANE) * LANE)
    return tile_b, tile_m


def fully_conv_layer(x_nchw, weight, bias, *, target_block_bytes=_TARGET_BLOCK_BYTES):
    """1x1 Conv2d(C -> 1) with bias.  x: [B, C, N, W] -> [B, 1, N, W]."""
    B, C, N, W = x_nchw.shape
    M = N * W
    dtype = x_nchw.dtype
    itemsize = jnp.dtype(dtype).itemsize

    # Native layout kept: free reshape only (no pad, no transpose through HBM).
    x3d = x_nchw.reshape(B, C, M)
    w1d = weight.reshape(C).astype(jnp.float32)   # SMEM scalars
    b1d = bias.reshape(1).astype(jnp.float32)

    tile_b, tile_m = _choose_tiling(B, C, M, itemsize, target_block_bytes)
    grid = (pl.cdiv(B, tile_b), pl.cdiv(M, tile_m))

    in_blk_bytes = tile_b * C * tile_m * itemsize
    out_blk_bytes = tile_b * tile_m * itemsize
    # 2x double-buffered in + out, plus slack; safe on v5e(128)/v6e(128)/v7x(64 MiB).
    vmem_limit = int(min(48 << 20,
                         max(32 << 20, 2 * (in_blk_bytes + out_blk_bytes) + (4 << 20))))

    kernel = _make_kernel(tile_b, C, tile_m, _CHUNK)

    out3d = pl.pallas_call(
        kernel,
        out_shape=jax.ShapeDtypeStruct((B, 1, M), dtype),
        grid=grid,
        in_specs=[
            pl.BlockSpec((tile_b, C, tile_m), lambda b, m: (b, 0, m)),
            pl.BlockSpec(memory_space=pltpu.MemorySpace.SMEM),   # weights
            pl.BlockSpec(memory_space=pltpu.MemorySpace.SMEM),   # bias
        ],
        out_specs=pl.BlockSpec((tile_b, 1, tile_m), lambda b, m: (b, 0, m)),
        compiler_params=pltpu.CompilerParams(
            dimension_semantics=("parallel", "parallel"),
            vmem_limit_bytes=vmem_limit),
        cost_estimate=pl.CostEstimate(
            flops=2 * B * C * M,
            transcendentals=0,
            bytes_accessed=(B * C * M + B * M) * itemsize + (C + 1) * 4),
    )(x3d, w1d, b1d)

    return out3d.reshape(B, 1, N, W)


if __name__ == "__main__":
    key = jax.random.PRNGKey(0)
    kx, kw, kb = jax.random.split(key, 3)

    # Small shapes consistent with the module: B=2, C=4 channels, N=16 nodes, W=1.
    B, C, N, W = 2, 4, 16, 1
    x = jax.random.normal(kx, (B, C, N, W), dtype=jnp.float32)
    weight = jax.random.normal(kw, (1, C, 1, 1), dtype=jnp.float32) * 0.1
    bias = jax.random.normal(kb, (1,), dtype=jnp.float32) * 0.1

    out = jax.block_until_ready(fully_conv_layer(x, weight, bias))
    ref = jnp.sum(x * weight.reshape(1, C, 1, 1), axis=1, keepdims=True) + bias[0]
    assert out.shape == (B, 1, N, W), out.shape
    assert jnp.allclose(out, ref, atol=1e-5, rtol=1e-5), float(
        jnp.max(jnp.abs(out - ref)))

    # Exercise the multi-chunk path (inner fori + remainder chunk) and batch tiling.
    B2, C2, N2, W2 = 3, 4, 64, 37            # M = 2368 (> chunk, not lane-aligned)
    x2 = jax.random.normal(kx, (B2, C2, N2, W2), dtype=jnp.float32)
    w2 = jax.random.normal(kw, (1, C2, 1, 1), dtype=jnp.float32) * 0.1
    b2 = jax.random.normal(kb, (1,), dtype=jnp.float32) * 0.1
    ref2 = jnp.sum(x2 * w2.reshape(1, C2, 1, 1), axis=1, keepdims=True) + b2[0]

    out2 = jax.block_until_ready(fully_conv_layer(x2, w2, b2))
    assert jnp.allclose(out2, ref2, atol=1e-5, rtol=1e-5), float(
        jnp.max(jnp.abs(out2 - ref2)))

    # Force spatial tiling with a partial (clipped) last tile — no wrapper pad needed.
    out3 = jax.block_until_ready(
        fully_conv_layer(x2, w2, b2, target_block_bytes=4096))
    assert jnp.allclose(out3, ref2, atol=1e-5, rtol=1e-5), float(
        jnp.max(jnp.abs(out3 - ref2)))

    print("KERNEL_OK")
</pallas_src>

<mosaic_0001>
module attributes {stable_mosaic.version = 11 : i64} {
  func.func @kernel(%arg0: i32, %arg1: i32, %arg2: memref<2x4x16xf32, #tpu.memory_space<vmem>>, %arg3: memref<4xf32, #tpu.memory_space<smem>>, %arg4: memref<1xf32, #tpu.memory_space<smem>>, %arg5: memref<2x1x16xf32, #tpu.memory_space<vmem>>) attributes {dimension_semantics = [#tpu.dimension_semantics<parallel>, #tpu.dimension_semantics<parallel>], iteration_bounds = array<i64: 1, 1>, scalar_prefetch = 0 : i64, scratch_operands = 0 : i64, tpu.core_type = #tpu.core_type<tc>, window_params = [{transform_indices = @transform_0, window_bounds = array<i64: 2, 4, 16>}, {transform_indices = @transform_1, window_bounds = array<i64: 4>}, {transform_indices = @transform_2, window_bounds = array<i64: 1>}, {transform_indices = @transform_3, window_bounds = array<i64: 2, 1, 16>}]} {
    %c0 = arith.constant 0 : index
    %c0_0 = arith.constant 0 : index
    %c0_1 = arith.constant 0 : index
    %0 = vector.load %arg2[%c0, %c0_0, %c0_1] : memref<2x4x16xf32, #tpu.memory_space<vmem>>, vector<1x4x16xf32>
    %1 = vector.shape_cast %0 : vector<1x4x16xf32> to vector<4x16xf32>
    %2 = vector.extract_strided_slice %1 {offsets = [0, 0], sizes = [1, 16], strides = [1, 1]} : vector<4x16xf32> to vector<1x16xf32>
    %c0_2 = arith.constant 0 : index
    %3 = memref.load %arg3[%c0_2] : memref<4xf32, #tpu.memory_space<smem>>
    %4 = vector.broadcast %3 : f32 to vector<1x16xf32>
    %5 = arith.mulf %2, %4 : vector<1x16xf32>
    %c0_3 = arith.constant 0 : index
    %6 = memref.load %arg4[%c0_3] : memref<1xf32, #tpu.memory_space<smem>>
    %7 = vector.broadcast %6 : f32 to vector<1x16xf32>
    %8 = arith.addf %5, %7 : vector<1x16xf32>
    %9 = vector.extract_strided_slice %1 {offsets = [1, 0], sizes = [1, 16], strides = [1, 1]} : vector<4x16xf32> to vector<1x16xf32>
    %c1 = arith.constant 1 : index
    %10 = memref.load %arg3[%c1] : memref<4xf32, #tpu.memory_space<smem>>
    %11 = vector.broadcast %10 : f32 to vector<1x16xf32>
    %12 = arith.mulf %9, %11 : vector<1x16xf32>
    %13 = arith.addf %8, %12 : vector<1x16xf32>
    %14 = vector.extract_strided_slice %1 {offsets = [2, 0], sizes = [1, 16], strides = [1, 1]} : vector<4x16xf32> to vector<1x16xf32>
    %c2 = arith.constant 2 : index
    %15 = memref.load %arg3[%c2] : memref<4xf32, #tpu.memory_space<smem>>
    %16 = vector.broadcast %15 : f32 to vector<1x16xf32>
    %17 = arith.mulf %14, %16 : vector<1x16xf32>
    %18 = arith.addf %13, %17 : vector<1x16xf32>
    %19 = vector.extract_strided_slice %1 {offsets = [3, 0], sizes = [1, 16], strides = [1, 1]} : vector<4x16xf32> to vector<1x16xf32>
    %c3 = arith.constant 3 : index
    %20 = memref.load %arg3[%c3] : memref<4xf32, #tpu.memory_space<smem>>
    %21 = vector.broadcast %20 : f32 to vector<1x16xf32>
    %22 = arith.mulf %19, %21 : vector<1x16xf32>
    %23 = arith.addf %18, %22 : vector<1x16xf32>
    %c0_4 = arith.constant 0 : index
    %c0_5 = arith.constant 0 : index
    %c0_6 = arith.constant 0 : index
    %24 = vector.load %arg5[%c0_4, %c0_5, %c0_6] : memref<2x1x16xf32, #tpu.memory_space<vmem>>, vector<1x1x16xf32>
    %25 = vector.shape_cast %24 : vector<1x1x16xf32> to vector<1x16xf32>
    %26 = vector.shape_cast %23 : vector<1x16xf32> to vector<1x1x16xf32>
    tpu.vector_store %arg5[%c0_4, %c0_5, %c0_6], %26 {strides = array<i32>} : memref<2x1x16xf32, #tpu.memory_space<vmem>>, vector<1x1x16xf32>,
    %c1_7 = arith.constant 1 : index
    %c0_8 = arith.constant 0 : index
    %c0_9 = arith.constant 0 : index
    %27 = vector.load %arg2[%c1_7, %c0_8, %c0_9] : memref<2x4x16xf32, #tpu.memory_space<vmem>>, vector<1x4x16xf32>
    %28 = vector.shape_cast %27 : vector<1x4x16xf32> to vector<4x16xf32>
    %29 = vector.extract_strided_slice %28 {offsets = [0, 0], sizes = [1, 16], strides = [1, 1]} : vector<4x16xf32> to vector<1x16xf32>
    %c0_10 = arith.constant 0 : index
    %30 = memref.load %arg3[%c0_10] : memref<4xf32, #tpu.memory_space<smem>>
    %31 = vector.broadcast %30 : f32 to vector<1x16xf32>
    %32 = arith.mulf %29, %31 : vector<1x16xf32>
    %c0_11 = arith.constant 0 : index
    %33 = memref.load %arg4[%c0_11] : memref<1xf32, #tpu.memory_space<smem>>
    %34 = vector.broadcast %33 : f32 to vector<1x16xf32>
    %35 = arith.addf %32, %34 : vector<1x16xf32>
    %36 = vector.extract_strided_slice %28 {offsets = [1, 0], sizes = [1, 16], strides = [1, 1]} : vector<4x16xf32> to vector<1x16xf32>
    %c1_12 = arith.constant 1 : index
    %37 = memref.load %arg3[%c1_12] : memref<4xf32, #tpu.memory_space<smem>>
    %38 = vector.broadcast %37 : f32 to vector<1x16xf32>
    %39 = arith.mulf %36, %38 : vector<1x16xf32>
    %40 = arith.addf %35, %39 : vector<1x16xf32>
    %41 = vector.extract_strided_slice %28 {offsets = [2, 0], sizes = [1, 16], strides = [1, 1]} : vector<4x16xf32> to vector<1x16xf32>
    %c2_13 = arith.constant 2 : index
    %42 = memref.load %arg3[%c2_13] : memref<4xf32, #tpu.memory_space<smem>>
    %43 = vector.broadcast %42 : f32 to vector<1x16xf32>
    %44 = arith.mulf %41, %43 : vector<1x16xf32>
    %45 = arith.addf %40, %44 : vector<1x16xf32>
    %46 = vector.extract_strided_slice %28 {offsets = [3, 0], sizes = [1, 16], strides = [1, 1]} : vector<4x16xf32> to vector<1x16xf32>
    %c3_14 = arith.constant 3 : index
    %47 = memref.load %arg3[%c3_14] : memref<4xf32, #tpu.memory_space<smem>>
    %48 = vector.broadcast %47 : f32 to vector<1x16xf32>
    %49 = arith.mulf %46, %48 : vector<1x16xf32>
    %50 = arith.addf %45, %49 : vector<1x16xf32>
    %c1_15 = arith.constant 1 : index
    %c0_16 = arith.constant 0 : index
    %c0_17 = arith.constant 0 : index
    %51 = vector.load %arg5[%c1_15, %c0_16, %c0_17] : memref<2x1x16xf32, #tpu.memory_space<vmem>>, vector<1x1x16xf32>
    %52 = vector.shape_cast %51 : vector<1x1x16xf32> to vector<1x16xf32>
    %53 = vector.shape_cast %50 : vector<1x16xf32> to vector<1x1x16xf32>
    tpu.vector_store %arg5[%c1_15, %c0_16, %c0_17], %53 {strides = array<i32>} : memref<2x1x16xf32, #tpu.memory_space<vmem>>, vector<1x1x16xf32>,
    return
  }
  func.func @transform_0(%arg0: i32, %arg1: i32) -> (i32, i32, i32) {
    %c0_i32 = arith.constant 0 : i32
    %c0_i32_0 = arith.constant 0 : i32
    return %arg0, %c0_i32, %arg1 : i32, i32, i32
  }
  func.func @transform_1(%arg0: i32, %arg1: i32) -> i32 {
    %c0_i32 = arith.constant 0 : i32
    %c0_i32_0 = arith.constant 0 : i32
    return %c0_i32 : i32
  }
  func.func @transform_2(%arg0: i32, %arg1: i32) -> i32 {
    %c0_i32 = arith.constant 0 : i32
    %c0_i32_0 = arith.constant 0 : i32
    return %c0_i32 : i32
  }
  func.func @transform_3(%arg0: i32, %arg1: i32) -> (i32, i32, i32) {
    %c0_i32 = arith.constant 0 : i32
    %c0_i32_0 = arith.constant 0 : i32
    return %arg0, %c0_i32, %arg1 : i32, i32, i32
  }
}

</mosaic_0001>

<bundles_post_ra>
// kernel: tpu_custom_call.1
= control target key start
LH: loop header
LB: loop body
LE: loop exit
PB: predicated region body
PF: predicated region fallthrough
CT: control target
= control target key end

     0   :  { %9 = vsyncpa [#allocation4], 0  ;;  %s244_s0 = inlined_call_operand.hbm [shape: f32[2,4,16], index: 0, kind: input, shape index: {}]   ;;  %s245_s1 = inlined_call_operand.vmem [shape: f32[4], index: 1, kind: input, shape index: {}]   ;;  %s246_s2 = inlined_call_operand.<no memory space> [shape: f32[1], index: 2, kind: input, shape index: {}]   ;;  %s247_s3 = inlined_call_operand.hbm [shape: f32[2,1,16], index: 3, kind: output, shape index: {}]  }
   0x1   :  { %10 = vsyncpa [#allocation6], 0 }
   0x2   :  { %11 = vsyncpa [#allocation5], 0  ;;  %s16_s14 = sshll.u32 %s244_s0, 4  ;;  %s205_s15 = smov [#allocation3]   ;;  %s17_s14 = int_to_ptr.hbm [resolvable:$true] %s16_s14 }
   0x3   :  { %s18_s16 = sshll.u32 %s205_s15, 4  ;;  %s30_s19 = sshll.u32 %s245_s1, 4  ;;  %s19_s16 = int_to_ptr.vmem [resolvable:$true] %s18_s16  ;;  %s31_s19 = int_to_ptr.vmem [resolvable:$true] %s30_s19 }
   0x4   :  { %s206_s20 = smov 64   ;;  %s207_s21 = smov 4  }
   0x5   :  { %24 = dma.hbm_to_vmem [thread:$0]  %s17_s14, 128, %s19_s16, [#allocation4], %s206_s20, %s206_s20, %s207_s21  }
   0x6   :  { %s208_s22 = smov [#allocation7]  }
   0x7   :  { %33 = dma.vmem_to_smem %s31_s19, 16, %s208_s22, [#allocation6]  }
   0x8   :  { %199 = dma.done.wait [#allocation4], 128  }
   0x9   :  { %200 = vsyncadd [#allocation4], 4294967168 }
   0xa   :  { %201 = dma.done.wait [#allocation6], 16  }
   0xb   :  { %202 = vsyncadd [#allocation6], 4294967280 }
   0xc   :  { %44 = sfence }
   0xd   :  { %s46_s0 = sld [smem:[#allocation7]]  ;;  %v45_v0 = vld [vmem:[#allocation3] sm:$0xf]  ;;  %v76_v1 = vld [vmem:[#allocation3 + $0x4] sm:$0xf]  ;;  %v50_v3 = vstv %s246_s2  ;;  %s209_s2 = smov [#allocation8]  }
   0xe   :  { %s126_s23 = sld [smem:[#allocation7 + $0x1]]  ;;  %s110_s27 = sshll.u32 %s209_s2, 4  ;;  %vm73_vm0 = vcmask 122880   ;;  %s111_s27 = int_to_ptr.vmem [resolvable:$true] %s110_s27 }
   0xf   :  { %s127_s24 = sld [smem:[#allocation7 + $0x2]]  ;;  %s112_s30 = sshll.u32 %s247_s3, 4  ;;  %s113_s30 = int_to_ptr.hbm [resolvable:$true] %s112_s30 }
  0x10   :  { %s128_s25 = sld [smem:[#allocation7 + $0x3]]  ;;  %s210_s4 = smov 16  }
  0x11   :  { %s211_s5 = smov 1  }
  0x13   :  { %v47_v2 = vstv %s46_s0 }
  0x14   :  { %v48_v4 = vmul.f32 %v47_v2, %v45_v0  ;;  %v53_v5 = vstv %s126_s23  ;;  %v79_v6 = vmul.f32 %v76_v1, %v47_v2 }
  0x15   :  { %v54_v7 = vmul.f32 %v53_v5, %v45_v0  ;;  %v60_v8 = vstv %s127_s24  ;;  %v85_v9 = vmul.f32 %v76_v1, %v53_v5 }
  0x16   :  { %v51_v10 = vadd.f32 %v50_v3, %v48_v4  ;;  %v61_v11 = vmul.f32 %v60_v8, %v45_v0  ;;  %v67_v12 = vstv %s128_s25  ;;  %v82_v13 = vadd.f32 %v79_v6, %v50_v3 }
  0x17   :  { %v56_v14 = vrot.slane %v54_v7, 1  ;;  %v68_v15 = vmul.f32 %v67_v12, %v45_v0  ;;  %v87_v16 = vrot.slane %v85_v9, 1  ;;  %v92_v17 = vmul.f32 %v76_v1, %v60_v8 }
  0x18   :  { %v63_v18 = vrot.slane %v61_v11, 2  ;;  %v99_v19 = vmul.f32 %v76_v1, %v67_v12 }
  0x19   :  { %v58_v20 = vadd.f32 %v56_v14, %v51_v10  ;;  %v70_v21 = vrot.slane %v68_v15, 3  ;;  %v89_v22 = vadd.f32 %v87_v16, %v82_v13  ;;  %v94_v23 = vrot.slane %v92_v17, 2 }
  0x1a   :  { %v101_v24 = vrot.slane %v99_v19, 3 }
  0x1b   :  { %v65_v25 = vadd.f32 %v63_v18, %v58_v20  ;;  %v96_v26 = vadd.f32 %v94_v23, %v89_v22 }
  0x1d   :  { %v72_v27 = vadd.f32 %v70_v21, %v65_v25  ;;  %v103_v28 = vadd.f32 %v101_v24, %v96_v26 }
  0x1f   :  { %74 = vst.msk [vmem:[#allocation8] sm:$0x1] %vm73_vm0, %v72_v27 }
  0x20   :  { %105 = vst.msk [vmem:[#allocation8 + $0x1] sm:$0x1] %vm73_vm0, %v103_v28 }
  0x21   :  { %118 = dma.vmem_to_hbm [thread:$0]  %s111_s27, 32, %s113_s30, [#allocation5], %s210_s4, %s210_s4, %s211_s5  }
  0x22   :  { %203 = dma.done.wait [#allocation5], 32  }
  0x23   :  { %204 = vsyncadd [#allocation5], 4294967264 }
  0x24   :  { %123 = vsyncpa [#allocation4], 1 }
  0x25   :  { %124 = vsyncpa [#allocation5], 1 }
  0x26   :  { %125 = vsyncpa [#allocation6], 1 }

</bundles_post_ra>
